<compile_context>
chip_gen: v5e
topology: v5e:2x2
jax: 0.10.0
libtpu: 0.0.40
codegen_flags: <defaults>
</compile_context>

<pallas_src>
import jax
import jax.numpy as jnp
from jax.experimental import pallas as pl
from jax.experimental.pallas import tpu as pltpu


_LANE = 128


def _round_up(x, m):
    return ((x + m - 1) // m) * m


def _round_down(x, m):
    return (x // m) * m


def _sublane(itemsize):
    # Sublane tiling multiple per element width: f32 -> 8, bf16 -> 16, i8 -> 32.
    return 8 * max(1, 4 // max(1, itemsize))


# ------------------------------ fast path -------------------------------- #
def _copy_cast_kernel(x_ref, o_ref):
    """Dense lane-aligned block copy + dtype cast (no relayout)."""
    o_ref[...] = x_ref[...].astype(o_ref.dtype)


def _pick_tile_n_fast(n, d, in_itemsize, out_itemsize, target_bytes):
    """Row tile for the (K, n_tiles) grid.

    Per-step VMEM = 2 (double buffer) * tile_n * D * (in + out itemsize);
    tile_n is kept a multiple of 16 (legal for f32 and bf16 sublane tiling)
    and capped so the row axis gets ~8+ pipeline steps when n allows.
    """
    per_row = 2 * d * (in_itemsize + out_itemsize)
    t = max(1, target_bytes // max(1, per_row))
    # Keep several steps along the row axis: pipeline overlap + v7x megacore.
    t = min(t, max(16, _round_up(pl.cdiv(n, 8), 16)))
    if t >= n:
        return n
    t = max(16, _round_down(t, 16))
    if n % t:
        # Prefer a divisor of n (avoids a masked tail block) without giving
        # up more than half the tile size.
        for cand in range(t, max(16, t // 2) - 1, -16):
            if n % cand == 0:
                return cand
    return min(t, n)


# ------------------------------ fallback --------------------------------- #
def _split_relayout_kernel(x_ref, o_ref):
    """Fallback body (D not lane-aligned): contiguous (tile_n, K, D) in,
    small static sublane relayout to (K, tile_n, D) out."""
    k = o_ref.shape[0]
    for i in range(k):  # small static unroll
        o_ref[i, :, :] = x_ref[:, i, :].astype(o_ref.dtype)


def _pick_tile_n_fallback(n, k, d, in_itemsize, out_itemsize, target_bytes):
    """Padding-aware tile pick: input block puts K on the sublane axis
    (pads to 8/16/32) and D on the lane axis (pads to 128)."""
    d_pad = _round_up(d, _LANE)
    k_pad_in = _round_up(k, _sublane(in_itemsize))
    per_row = 2 * d_pad * (k_pad_in * in_itemsize + k * out_itemsize)
    t = max(1, target_bytes // max(1, per_row))
    if t >= n:
        return n
    return min(n, max(16, _round_down(t, 16)))


# ------------------------------ wrapper ----------------------------------- #
def stochastic_transformation_split(features, num_transformations, *,
                                    out_dtype=jnp.float32, tile_n=None,
                                    target_bytes=8 << 20):
    """Pallas equivalent of the reference forward's body:
        split_features[i, j, :] = features[j * K + i, :]   (== features[i::K])
    Returns (K, T // K, D) in `out_dtype` (float32 by default, matching
    torch.zeros).  Pass out_dtype=features.dtype for a bandwidth-saving
    passthrough when downstream code can consume the native dtype.
    """
    T, D = features.shape
    K = int(num_transformations)
    if T % K != 0:
        raise ValueError("T must be a multiple of num_transformations")
    n = T // K
    in_it = jnp.dtype(features.dtype).itemsize
    out_it = jnp.dtype(out_dtype).itemsize

    fast = (D % _LANE == 0) or K == 1
    if fast:
        if tile_n is None:
            tile_n = _pick_tile_n_fast(n, D, in_it, out_it, target_bytes)
        # Free contiguous view: x2[j, i*D:(i+1)*D] == features[j*K + i, :].
        x2 = features.reshape(n, K * D)
        # Explicit scoped-VMEM limit sized to the double-buffered footprint.
        step_bytes = 2 * tile_n * D * (in_it + out_it)
        vmem_limit = int(min(64 << 20, max(32 << 20, step_bytes + (8 << 20))))
        return pl.pallas_call(
            _copy_cast_kernel,
            out_shape=jax.ShapeDtypeStruct((K, n, D), out_dtype),
            grid_spec=pltpu.PrefetchScalarGridSpec(
                num_scalar_prefetch=0,
                grid=(K, pl.cdiv(n, tile_n)),
                # Lane-dense (tile_n, D) input slab: transformation i, row tile j.
                in_specs=[pl.BlockSpec((tile_n, D), lambda i, j: (j, i))],
                # Lane-dense, contiguous (tile_n, D) slab of split_features[i].
                out_specs=pl.BlockSpec((None, tile_n, D),
                                       lambda i, j: (i, j, 0)),
            ),
            compiler_params=pltpu.CompilerParams(
                dimension_semantics=("parallel", "parallel"),
                vmem_limit_bytes=vmem_limit),
        )(x2)

    # ---- fallback: D not lane-aligned (toy shapes); correctness-first ----
    if tile_n is None:
        tile_n = _pick_tile_n_fallback(n, K, D, in_it, out_it, target_bytes)
    x3 = features.reshape(n, K, D)
    d_pad = _round_up(D, _LANE)
    in_bytes = tile_n * _round_up(K, _sublane(in_it)) * d_pad * in_it
    out_bytes = K * _round_up(tile_n, _sublane(out_it)) * d_pad * out_it
    vmem_limit = int(min(64 << 20,
                         max(32 << 20, 2 * (in_bytes + out_bytes) + (8 << 20))))
    return pl.pallas_call(
        _split_relayout_kernel,
        out_shape=jax.ShapeDtypeStruct((K, n, D), out_dtype),
        grid_spec=pltpu.PrefetchScalarGridSpec(
            num_scalar_prefetch=0,
            grid=(pl.cdiv(n, tile_n),),
            in_specs=[pl.BlockSpec((tile_n, K, D), lambda j: (j, 0, 0))],
            out_specs=pl.BlockSpec((K, tile_n, D), lambda j: (0, j, 0)),
        ),
        compiler_params=pltpu.CompilerParams(
            dimension_semantics=("parallel",),
            vmem_limit_bytes=vmem_limit),
    )(x3)


if __name__ == "__main__":
    key = jax.random.PRNGKey(0)

    def _ref(feats, k, dt):
        return jnp.stack([feats[i::k] for i in range(k)], axis=0).astype(dt)

    # --- toy shape from the module docstring (D not 128-aligned -> fallback) ---
    T0, D0, K0 = 8, 32, 4
    f0 = jax.random.normal(key, (T0, D0), dtype=jnp.float32)
    o0 = jax.block_until_ready(stochastic_transformation_split(f0, K0))
    assert o0.shape == (K0, T0 // K0, D0) and o0.dtype == jnp.float32
    assert jnp.array_equal(o0, _ref(f0, K0, jnp.float32))

    # --- lane-aligned bf16 input, multi-step 2-D grid (fast path) ---
    T1, D1, K1 = 256, 128, 4
    f1 = jax.random.normal(jax.random.PRNGKey(0), (T1, D1), dtype=jnp.bfloat16)
    o1 = jax.block_until_ready(stochastic_transformation_split(f1, K1))
    assert o1.shape == (K1, T1 // K1, D1) and o1.dtype == jnp.float32
    assert jnp.array_equal(o1, _ref(f1, K1, jnp.float32))

    # --- fast path with a masked tail block (tile_n does not divide n) ---
    T2, D2, K2 = 160, 128, 4      # n = 40, tile_n = 16 -> tail of 8 rows
    f2 = jax.random.normal(jax.random.PRNGKey(0), (T2, D2), dtype=jnp.float32)
    o2 = jax.block_until_ready(stochastic_transformation_split(f2, K2))
    assert o2.shape == (K2, T2 // K2, D2)
    assert jnp.array_equal(o2, _ref(f2, K2, jnp.float32))

    # --- bf16 passthrough output (bandwidth fast path) ---
    o3 = jax.block_until_ready(
        stochastic_transformation_split(f1, K1, out_dtype=jnp.bfloat16))
    assert o3.dtype == jnp.bfloat16
    assert jnp.array_equal(o3, _ref(f1, K1, jnp.bfloat16))

    print("KERNEL_OK")
</pallas_src>

<mosaic_0001>
module attributes {stable_mosaic.version = 11 : i64} {
  func.func @_split_relayout_kernel(%arg0: i32, %arg1: memref<2x4x32xf32, #tpu.memory_space<vmem>>, %arg2: memref<4x2x32xf32, #tpu.memory_space<vmem>>) attributes {dimension_semantics = [#tpu.dimension_semantics<parallel>], iteration_bounds = array<i64: 1>, scalar_prefetch = 0 : i64, scratch_operands = 0 : i64, tpu.core_type = #tpu.core_type<tc>, window_params = [{transform_indices = @transform_0, window_bounds = array<i64: 2, 4, 32>}, {transform_indices = @transform_1, window_bounds = array<i64: 4, 2, 32>}]} {
    %c0 = arith.constant 0 : index
    %c0_0 = arith.constant 0 : index
    %c0_1 = arith.constant 0 : index
    %0 = vector.load %arg1[%c0, %c0_0, %c0_1] : memref<2x4x32xf32, #tpu.memory_space<vmem>>, vector<2x1x32xf32>
    %1 = vector.shape_cast %0 : vector<2x1x32xf32> to vector<2x32xf32>
    %c0_2 = arith.constant 0 : index
    %c0_3 = arith.constant 0 : index
    %c0_4 = arith.constant 0 : index
    %2 = vector.load %arg2[%c0_2, %c0_3, %c0_4] : memref<4x2x32xf32, #tpu.memory_space<vmem>>, vector<1x2x32xf32>
    %3 = vector.shape_cast %2 : vector<1x2x32xf32> to vector<2x32xf32>
    %4 = vector.shape_cast %1 : vector<2x32xf32> to vector<1x2x32xf32>
    tpu.vector_store %arg2[%c0_2, %c0_3, %c0_4], %4 {strides = array<i32>} : memref<4x2x32xf32, #tpu.memory_space<vmem>>, vector<1x2x32xf32>,
    %c0_5 = arith.constant 0 : index
    %c1 = arith.constant 1 : index
    %c0_6 = arith.constant 0 : index
    %5 = vector.load %arg1[%c0_5, %c1, %c0_6] : memref<2x4x32xf32, #tpu.memory_space<vmem>>, vector<2x1x32xf32>
    %6 = vector.shape_cast %5 : vector<2x1x32xf32> to vector<2x32xf32>
    %c1_7 = arith.constant 1 : index
    %c0_8 = arith.constant 0 : index
    %c0_9 = arith.constant 0 : index
    %7 = vector.load %arg2[%c1_7, %c0_8, %c0_9] : memref<4x2x32xf32, #tpu.memory_space<vmem>>, vector<1x2x32xf32>
    %8 = vector.shape_cast %7 : vector<1x2x32xf32> to vector<2x32xf32>
    %9 = vector.shape_cast %6 : vector<2x32xf32> to vector<1x2x32xf32>
    tpu.vector_store %arg2[%c1_7, %c0_8, %c0_9], %9 {strides = array<i32>} : memref<4x2x32xf32, #tpu.memory_space<vmem>>, vector<1x2x32xf32>,
    %c0_10 = arith.constant 0 : index
    %c2 = arith.constant 2 : index
    %c0_11 = arith.constant 0 : index
    %10 = vector.load %arg1[%c0_10, %c2, %c0_11] : memref<2x4x32xf32, #tpu.memory_space<vmem>>, vector<2x1x32xf32>
    %11 = vector.shape_cast %10 : vector<2x1x32xf32> to vector<2x32xf32>
    %c2_12 = arith.constant 2 : index
    %c0_13 = arith.constant 0 : index
    %c0_14 = arith.constant 0 : index
    %12 = vector.load %arg2[%c2_12, %c0_13, %c0_14] : memref<4x2x32xf32, #tpu.memory_space<vmem>>, vector<1x2x32xf32>
    %13 = vector.shape_cast %12 : vector<1x2x32xf32> to vector<2x32xf32>
    %14 = vector.shape_cast %11 : vector<2x32xf32> to vector<1x2x32xf32>
    tpu.vector_store %arg2[%c2_12, %c0_13, %c0_14], %14 {strides = array<i32>} : memref<4x2x32xf32, #tpu.memory_space<vmem>>, vector<1x2x32xf32>,
    %c0_15 = arith.constant 0 : index
    %c3 = arith.constant 3 : index
    %c0_16 = arith.constant 0 : index
    %15 = vector.load %arg1[%c0_15, %c3, %c0_16] : memref<2x4x32xf32, #tpu.memory_space<vmem>>, vector<2x1x32xf32>
    %16 = vector.shape_cast %15 : vector<2x1x32xf32> to vector<2x32xf32>
    %c3_17 = arith.constant 3 : index
    %c0_18 = arith.constant 0 : index
    %c0_19 = arith.constant 0 : index
    %17 = vector.load %arg2[%c3_17, %c0_18, %c0_19] : memref<4x2x32xf32, #tpu.memory_space<vmem>>, vector<1x2x32xf32>
    %18 = vector.shape_cast %17 : vector<1x2x32xf32> to vector<2x32xf32>
    %19 = vector.shape_cast %16 : vector<2x32xf32> to vector<1x2x32xf32>
    tpu.vector_store %arg2[%c3_17, %c0_18, %c0_19], %19 {strides = array<i32>} : memref<4x2x32xf32, #tpu.memory_space<vmem>>, vector<1x2x32xf32>,
    return
  }
  func.func @transform_0(%arg0: i32) -> (i32, i32, i32) {
    %c0_i32 = arith.constant 0 : i32
    %c0_i32_0 = arith.constant 0 : i32
    %c0_i32_1 = arith.constant 0 : i32
    return %arg0, %c0_i32, %c0_i32_0 : i32, i32, i32
  }
  func.func @transform_1(%arg0: i32) -> (i32, i32, i32) {
    %c0_i32 = arith.constant 0 : i32
    %c0_i32_0 = arith.constant 0 : i32
    %c0_i32_1 = arith.constant 0 : i32
    return %c0_i32, %arg0, %c0_i32_0 : i32, i32, i32
  }
}

</mosaic_0001>

<bundles_post_ra>
// kernel: tpu_custom_call.1
= control target key start
LH: loop header
LB: loop body
LE: loop exit
PB: predicated region body
PF: predicated region fallthrough
CT: control target
= control target key end

     0   :  { %6 = vsyncpa [#allocation3], 0  ;;  %s169_s0 = inlined_call_operand.hbm [shape: f32[2,4,32], index: 0, kind: input, shape index: {}]   ;;  %s170_s1 = inlined_call_operand.hbm [shape: f32[4,2,32], index: 1, kind: output, shape index: {}]  }
   0x1   :  { %7 = vsyncpa [#allocation4], 0  ;;  %s12_s8 = sshll.u32 %s169_s0, 4  ;;  %s139_s9 = smov [#allocation2]   ;;  %s13_s8 = int_to_ptr.hbm [resolvable:$true] %s12_s8 }
   0x2   :  { %s14_s10 = sshll.u32 %s139_s9, 4  ;;  %s140_s11 = smov 64   ;;  %s15_s10 = int_to_ptr.vmem [resolvable:$true] %s14_s10 }
   0x3   :  { %s141_s12 = smov 4  }
   0x4   :  { %20 = dma.hbm_to_vmem [thread:$0]  %s13_s8, 128, %s15_s10, [#allocation3], %s140_s11, %s140_s11, %s141_s12  }
   0x5   :  { %135 = dma.done.wait [#allocation3], 128  }
   0x6   :  { %136 = vsyncadd [#allocation3], 4294967168  ;;  %vm30_vm0 = vcmask 1041409   ;;  %v25_v0 = vld [vmem:[#allocation2] sm:$0x1]  ;;  %vm33_vm1 = vcmask 254976  }
   0x7   :  { %v26_v1 = vld [vmem:[#allocation2 + $0x4] sm:$0x1]  ;;  %s68_s15 = sshll.u32 %s170_s1, 4  ;;  %v35_v3 = vld [vmem:[#allocation2 + $0x1] sm:$0x1]  ;;  %s142_s0 = smov [#allocation5]   ;;  %s69_s15 = int_to_ptr.hbm [resolvable:$true] %s68_s15 }
   0x8   :  { %v29_v2 = vrot.slane %v26_v1, 7  ;;  %v36_v4 = vld [vmem:[#allocation2 + $0x5] sm:$0x1]  ;;  %s66_s16 = sshll.u32 %s142_s0, 4  ;;  %v44_v6 = vld [vmem:[#allocation2 + $0x2] sm:$0x1]  ;;  %s67_s16 = int_to_ptr.vmem [resolvable:$true] %s66_s16 }
   0x9   :  { %v39_v5 = vrot.slane %v36_v4, 7  ;;  %v45_v7 = vld [vmem:[#allocation2 + $0x6] sm:$0x1]  ;;  %v53_v10 = vld [vmem:[#allocation2 + $0x3] sm:$0x1]  ;;  %s143_s1 = smov 32  }
   0xa   :  { %v31_v8 = vsel %vm30_vm0, %v29_v2, %v25_v0  ;;  %v48_v9 = vrot.slane %v45_v7, 7  ;;  %v54_v11 = vld [vmem:[#allocation2 + $0x7] sm:$0x1]  ;;  %s144_s17 = smov 2  }
   0xb   :  { %34 = vst.msk [vmem:[#allocation5] sm:$0x3] %vm33_vm1, %v31_v8  ;;  %v40_v12 = vsel %vm30_vm0, %v39_v5, %v35_v3  ;;  %v57_v13 = vrot.slane %v54_v11, 7 }
   0xc   :  { %43 = vst.msk [vmem:[#allocation5 + $0x2] sm:$0x3] %vm33_vm1, %v40_v12  ;;  %v49_v14 = vsel %vm30_vm0, %v48_v9, %v44_v6 }
   0xd   :  { %52 = vst.msk [vmem:[#allocation5 + $0x4] sm:$0x3] %vm33_vm1, %v49_v14  ;;  %v58_v15 = vsel %vm30_vm0, %v57_v13, %v53_v10 }
   0xe   :  { %61 = vst.msk [vmem:[#allocation5 + $0x6] sm:$0x3] %vm33_vm1, %v58_v15 }
   0xf   :  { %74 = dma.vmem_to_hbm [thread:$0]  %s67_s16, 128, %s69_s15, [#allocation4], %s143_s1, %s143_s1, %s144_s17  }
  0x10   :  { %137 = dma.done.wait [#allocation4], 128  }
  0x11   :  { %138 = vsyncadd [#allocation4], 4294967168 }
  0x12   :  { %79 = vsyncpa [#allocation3], 1 }
  0x13   :  { %80 = vsyncpa [#allocation4], 1 }

</bundles_post_ra>
